<compile_context>
chip_gen: v5e
topology: v5e:2x2
jax: 0.10.0
libtpu: 0.0.40
codegen_flags: <defaults>
</compile_context>

<pallas_src>
import math
from typing import List, Tuple

import jax
import jax.numpy as jnp
from jax.experimental import pallas as pl
from jax.experimental.pallas import tpu as pltpu


# ----------------------- module construction helpers (init-time glue) -------
def factorize(n: int) -> List[int]:
    if n == 1:
        return [1]
    factors = []
    i = 2
    while i * i <= n:
        while n % i == 0:
            factors.append(i)
            n //= i
        i += 1
    if n != 1:
        factors.append(n)
    return factors


def shrink(dims: List[Tuple[int, int]], rank: int):
    cur_dims = (1, 1)
    result_dims = []
    for d1, d2 in dims:
        cur_dims = (cur_dims[0] * d1, cur_dims[1] * d2)
        if cur_dims[0] * cur_dims[1] >= rank:
            result_dims.append(cur_dims)
            cur_dims = (1, 1)
    if cur_dims[0] * cur_dims[1] != 1:
        result_dims.append(cur_dims)
    return result_dims


def make_ttm_params(dim_in: int, dim_out: int, rank: int, key):
    """Deterministic re-implementation of TTM.__init__ (parameter setup)."""
    dims_in = tuple(factorize(dim_in))
    dims_out = tuple(factorize(dim_out))
    dims_in += (1,) * (len(dims_out) - len(dims_in))
    dims_out += (1,) * (len(dims_in) - len(dims_out))
    dims = shrink(list(zip(dims_in, dims_out)), rank)
    n = len(dims)
    ranks = [1] + [rank] * (n - 1) + [1]
    keys = jax.random.split(key, n)
    cores = []
    for i, ((d1, d2), r1, r2) in enumerate(zip(dims, ranks[:-1], ranks[1:])):
        c = jax.random.normal(keys[i], (r1, d1, d2, r2), dtype=jnp.float32)
        cores.append(c / math.sqrt(d1 * d2 * r1))
    # QR orthogonalization exactly as in TTM.__init__ (init-time, plain JAX).
    state = jnp.eye(1, dtype=jnp.float32)
    new_cores = []
    for c in cores[:-1]:
        core = jnp.einsum('ij,jklm->iklm', state, c)
        shape = core.shape
        q, r_mat = jnp.linalg.qr(core.reshape(-1, shape[-1]))
        new_cores.append(q.reshape(shape))
        state = r_mat
    new_cores.append(jnp.einsum('ij,jklm->iklm', state, cores[-1]))
    return dims, new_cores


# ----------------- init-time weight re-layout (hoisted out of forward) ------
def precompute_ttm_weights(cores, dims, *, weight_dtype=jnp.bfloat16):
    """Build the structured / folded weight matrices ONCE at init time so the
    forward pass performs no per-call core re-layout XLA ops."""
    # TODO(synk): kernel is specialized to the 2-core TT chain this config
    # produces; >2 cores would need a chained contraction kernel.
    assert len(dims) == 2, "kernel specialized to a 2-core TT decomposition"
    (d0_in, d0_out), (d1_in, d1_out) = dims
    g0, g1 = cores                      # (1,d0_in,d0_out,R), (R,d1_in,d1_out,1)
    r = g0.shape[-1]
    dim_in, dim_out = d0_in * d1_in, d0_out * d1_out
    k_inner = d0_in * r * d1_out

    # Fold into a single dense matmul whenever the (dense) two-dot MAC count is
    # not smaller than the single-dot MAC count (exact by associativity; equals
    # TTM.full_tensor()).  True for the tested 16->16, rank=8 config.
    fold = k_inner * (dim_in + dim_out) >= dim_in * dim_out
    if fold:
        # W[(i0,i1),(o0,o1)] = sum_a g0[0,i0,o0,a] * g1[a,i1,o1,0]
        w = jnp.einsum('eabf,fcdg->acbd', g0, g1).reshape(dim_in, dim_out)
        mats = (w.astype(weight_dtype),)
        mode = "folded"
    else:
        # Structured two-dot path (kept only where TT genuinely saves FLOPs).
        # TODO(synk): at very large dims, eliminate the structured zeros
        # (block-diag / kron-identity) via a k_inner grid-reduction instead.
        g1_flat = jnp.transpose(g1[..., 0], (1, 0, 2)).reshape(d1_in, r * d1_out)
        g1_bd = jnp.kron(jnp.eye(d0_in, dtype=g1.dtype), g1_flat)
        g0_perm = jnp.transpose(g0[0], (0, 2, 1))            # (d0_in, r, d0_out)
        g0_stack = jnp.einsum('iao,pq->iapoq', g0_perm,
                              jnp.eye(d1_out, dtype=g0.dtype)
                              ).reshape(k_inner, dim_out)
        mats = (g1_bd.astype(weight_dtype), g0_stack.astype(weight_dtype))
        mode = "two_dot"
    return dict(mode=mode, dims=tuple(dims), dim_in=dim_in, dim_out=dim_out,
                k_inner=k_inner, mats=mats)


# ------------------------------- Pallas kernels ------------------------------
def _ttm_folded_kernel(x_ref, w_ref, o_ref):
    # Single MXU matmul: out = x @ W (bf16 inputs, f32 accumulation).
    o_ref[...] = jnp.dot(
        x_ref[...], w_ref[...],
        preferred_element_type=jnp.float32).astype(o_ref.dtype)


def _ttm_two_dot_kernel(x_ref, g1_ref, g0_ref, o_ref):
    # First TT contraction (MXU), then second TT contraction (MXU).
    t = jnp.dot(x_ref[...], g1_ref[...], preferred_element_type=jnp.float32)
    o_ref[...] = jnp.dot(
        t.astype(g0_ref.dtype), g0_ref[...],
        preferred_element_type=jnp.float32).astype(o_ref.dtype)


# ------------------------------- forward wrapper ------------------------------
def _pick_bm(b: int, bm_max: int) -> int:
    bm = min(b, bm_max)
    # Megacore: when B is large, guarantee >= 2 grid steps so the "parallel"
    # batch axis can shard across v7x's two TensorCores.
    if b > 256 and pl.cdiv(b, bm) < 2:
        bm = max(8, (((b + 1) // 2) + 7) // 8 * 8)
    return bm


def ttm_forward_pallas(x, weights, *, bm_max=1024, vmem_budget=48 << 20):
    mode = weights["mode"]
    dim_in, dim_out = weights["dim_in"], weights["dim_out"]
    mats = weights["mats"]
    b = x.shape[0]
    assert x.shape[1] == dim_in

    # bf16 into the MXU (2-3x MXU throughput, half the DMA bytes); f32 accum.
    x = x.astype(mats[0].dtype)
    w_bytes = sum(int(m.size) * m.dtype.itemsize for m in mats)

    bm = _pick_bm(b, bm_max)

    # Explicit VMEM budget (v7x: 64 MiB physical): bf16 x tile double-buffered,
    # weights single-buffered (Buffered(1)), f32 out tile double-buffered.
    def footprint(bm_):
        return 2 * bm_ * dim_in * 2 + w_bytes + 2 * bm_ * dim_out * 4

    while bm > 8 and footprint(bm) > vmem_budget:
        bm = max(8, bm // 2)
    vmem_limit = int(min(vmem_budget, max(4 * footprint(bm), 16 << 20)))

    grid = (pl.cdiv(b, bm),)   # non-divisible batch handled by masked tail block

    def weight_spec(shape):
        # Constant across the batch grid -> single buffer (halves weight VMEM).
        return pl.BlockSpec(shape, lambda i: (0, 0), pipeline_mode=pl.Buffered(1))

    if mode == "folded":
        kernel = _ttm_folded_kernel
        in_specs = [pl.BlockSpec((bm, dim_in), lambda i: (i, 0)),
                    weight_spec((dim_in, dim_out))]
    else:
        k_inner = weights["k_inner"]
        kernel = _ttm_two_dot_kernel
        in_specs = [pl.BlockSpec((bm, dim_in), lambda i: (i, 0)),
                    weight_spec((dim_in, k_inner)),
                    weight_spec((k_inner, dim_out))]

    # TODO(synk): dim_out < 128 leaves masked (vst.msk) output stores; at
    # production dims choose a TT factorization whose last output dim (and
    # k_inner) is a multiple of 128/256 to fill the MXU and keep stores dense.
    return pl.pallas_call(
        kernel,
        out_shape=jax.ShapeDtypeStruct((b, dim_out), jnp.float32),
        grid=grid,
        in_specs=in_specs,
        out_specs=pl.BlockSpec((bm, dim_out), lambda i: (i, 0)),
        compiler_params=pltpu.CompilerParams(
            dimension_semantics=("parallel",),
            vmem_limit_bytes=vmem_limit),
    )(x, *mats)


# ------------------------------------ main ------------------------------------
if __name__ == "__main__":
    dim_in, dim_out, rank, batch = 16, 16, 8, 8
    key = jax.random.PRNGKey(0)
    kp, kx = jax.random.split(key)

    dims, cores = make_ttm_params(dim_in, dim_out, rank, kp)
    # For (16, 16, rank=8): factorize -> (2,2,2,2); shrink -> [(4,4),(4,4)]
    assert dims == [(4, 4), (4, 4)]

    # Hoisted to init time (perf review): no per-forward weight re-layout ops.
    weights = precompute_ttm_weights(cores, dims)
    assert weights["mode"] == "folded"   # TT saves no FLOPs at this tiny config

    x = jax.random.normal(kx, (batch, dim_in), dtype=jnp.float32)

    fwd = jax.jit(lambda xx: ttm_forward_pallas(xx, weights))
    y = jax.block_until_ready(fwd(x))

    # reference: the exact einsum TTM.forward builds for 2 cores (f32 cores).
    g0, g1 = cores
    ref = jnp.einsum(
        'eabf,fcdg,hac->hbd', g0, g1,
        x.reshape(batch, dims[0][0], dims[1][0])).reshape(batch, -1)

    assert y.shape == (batch, dim_out)
    # bf16 MXU inputs with f32 accumulation -> loosened tolerance vs f32 ref.
    assert jnp.allclose(y, ref, atol=2e-2, rtol=2e-2), "mismatch vs reference"
    print("KERNEL_OK")
</pallas_src>

<mosaic_0001>
module attributes {stable_mosaic.version = 11 : i64} {
  func.func @_ttm_folded_kernel(%arg0: i32, %arg1: memref<8x16xbf16, #tpu.memory_space<vmem>>, %arg2: memref<16x16xbf16, #tpu.memory_space<vmem>>, %arg3: memref<8x16xf32, #tpu.memory_space<vmem>>) attributes {dimension_semantics = [#tpu.dimension_semantics<parallel>], iteration_bounds = array<i64: 1>, scalar_prefetch = 0 : i64, scratch_operands = 0 : i64, tpu.core_type = #tpu.core_type<tc>, window_params = [{transform_indices = @transform_0, window_bounds = array<i64: 8, 16>}, {pipeline_mode = #tpu.pipeline_mode<synchronous>, transform_indices = @transform_1, window_bounds = array<i64: 16, 16>}, {transform_indices = @transform_2, window_bounds = array<i64: 8, 16>}]} {
    %c0 = arith.constant 0 : index
    %c0_0 = arith.constant 0 : index
    %0 = vector.load %arg1[%c0, %c0_0] : memref<8x16xbf16, #tpu.memory_space<vmem>>, vector<8x16xbf16>
    %c0_1 = arith.constant 0 : index
    %c0_2 = arith.constant 0 : index
    %1 = vector.load %arg2[%c0_1, %c0_2] : memref<16x16xbf16, #tpu.memory_space<vmem>>, vector<16x16xbf16>
    %cst = arith.constant dense<0.000000e+00> : vector<8x16xf32>
    %2 = tpu.matmul %0, %1, %cst {dimension_numbers = #tpu.dot_dimension_numbers<[1], [0], [0], [1], [0, 0, 1, 1], [], []>} : vector<8x16xbf16>, vector<16x16xbf16>, vector<8x16xf32> -> vector<8x16xf32>
    %c0_3 = arith.constant 0 : index
    %c0_4 = arith.constant 0 : index
    %3 = vector.load %arg3[%c0_3, %c0_4] : memref<8x16xf32, #tpu.memory_space<vmem>>, vector<8x16xf32>
    tpu.vector_store %arg3[%c0_3, %c0_4], %2 {strides = array<i32>} : memref<8x16xf32, #tpu.memory_space<vmem>>, vector<8x16xf32>,
    return
  }
  func.func @transform_0(%arg0: i32) -> (i32, i32) {
    %c0_i32 = arith.constant 0 : i32
    %c0_i32_0 = arith.constant 0 : i32
    return %arg0, %c0_i32 : i32, i32
  }
  func.func @transform_1(%arg0: i32) -> (i32, i32) {
    %c0_i32 = arith.constant 0 : i32
    %c0_i32_0 = arith.constant 0 : i32
    %c0_i32_1 = arith.constant 0 : i32
    return %c0_i32, %c0_i32_0 : i32, i32
  }
  func.func @transform_2(%arg0: i32) -> (i32, i32) {
    %c0_i32 = arith.constant 0 : i32
    %c0_i32_0 = arith.constant 0 : i32
    return %arg0, %c0_i32 : i32, i32
  }
}

</mosaic_0001>

<bundles_post_ra>
// kernel: _lambda_.1
= control target key start
LH: loop header
LB: loop body
LE: loop exit
PB: predicated region body
PF: predicated region fallthrough
CT: control target
= control target key end

     0   :  { %s114_s0 = inlined_call_operand.vmem [shape: bf16[8,16], index: 0, kind: input, shape index: {}]   ;;  %s115_s1 = inlined_call_operand.vmem [shape: bf16[16,16], index: 1, kind: input, shape index: {}]   ;;  %s116_s2 = inlined_call_operand.hbm [shape: f32[8,16], index: 2, kind: output, shape index: {}]  }
   0x1   :  { %v61_v0 = vld [vmem:[%s115_s1] sm:$0xff] }
   0x2   :  { %7 = vsyncpa [#allocation3], 0  ;;  %33 = vmatpush.bf16.msra.mxu0 %v61_v0  ;;  %v13_v1 = vld [vmem:[%s114_s0] sm:$0xf]  ;;  %vm22_vm0 = vcmask 130048   ;;  %s89_s13 = smov [#allocation2]  }
   0x3   :  { %s45_s14 = sshll.u32 %s89_s13, 4  ;;  %s47_s17 = sshll.u32 %s116_s2, 4  ;;  %s46_s14 = int_to_ptr.vmem [resolvable:$true] %s45_s14  ;;  %s48_s17 = int_to_ptr.hbm [resolvable:$true] %s47_s17 }
   0x5   :  { %60 = vmatmul.msk.bf16.vlgmr.msra.gmra.mxu0 %vm22_vm0, %v13_v1 }
  0x82   :  { %v35_v2 = vpop.f32.mrf.mxu0 }
  0x83   :  { %39 = vst.msk [vmem:[#allocation2] sm:$0xff] %vm22_vm0, %v35_v2 }
  0x84   :  { %50 = dma.vmem_to_hbm [thread:$0]  %s46_s14, 128, %s48_s17, [#allocation3]  }
  0x8a   :  { %v37_v3 = vpop.f32.mrf.mxu0 }
  0x8b   :  { %87 = dma.done.wait [#allocation3], 128  }
  0x8c   :  { %88 = vsyncadd [#allocation3], 4294967168 }
  0x8d   :  { %55 = vsyncpa [#allocation3], 1 }

</bundles_post_ra>
